<compile_context>
chip_gen: v7x
topology: tpu7x:2x2x1
jax: 0.10.0
libtpu: 0.0.40
codegen_flags: <defaults>
</compile_context>

<pallas_src>
import functools

import numpy as np
import jax
import jax.numpy as jnp
from jax.experimental import pallas as pl
from jax.experimental.pallas import tpu as pltpu

NUM_FACTORS = 8      # tfa_models.NUM_FACTORS (small synthetic value)
NUM_PARTICLES = 4    # tfa_models.NUM_PARTICLES (small synthetic value)

_BIG_LANE_TILE = 2048  # tiled path only for large, tile-aligned slabs

# Explicit site ordering: the flat eps layout is defined by this tuple.
_SITE_ORDER = (
    'template_factor_centers',
    'template_factor_log_widths',
    'block_factor_centers',
    'block_factor_log_widths',
    'block_weights',
)


def _reparam_kernel(mu_ref, ls_ref, eps_ref, out_ref):
    # mu/ls: (1, n) broadcast over particles -> exp once per lane column (EUP
    # slot, overlaps the VPU FMA). eps/out: (P, n).
    out_ref[...] = mu_ref[...] + jnp.exp(ls_ref[...]) * eps_ref[...]


def reparam_sample(mu_flat, log_sigma_flat, eps):
    """sample = mu + exp(log_sigma) * eps.

    mu_flat, log_sigma_flat: (N,) f32
    eps: (P, N) f32 (leading particle axis)
    returns: (P, N) f32
    """
    P, N = eps.shape
    mu2 = mu_flat.reshape(1, N)
    ls2 = log_sigma_flat.reshape(1, N)

    if N > _BIG_LANE_TILE and N % _BIG_LANE_TILE == 0:
        # Large-slab path (realistic HTFA sizes): big lane tiles, explicit
        # VMEM budget so double-buffering stays intact on v7x's 64 MiB VMEM.
        tile = _BIG_LANE_TILE
        return pl.pallas_call(
            _reparam_kernel,
            out_shape=jax.ShapeDtypeStruct((P, N), jnp.float32),
            grid=(N // tile,),
            in_specs=[
                pl.BlockSpec((1, tile), lambda j: (0, j)),
                pl.BlockSpec((1, tile), lambda j: (0, j)),
                pl.BlockSpec((P, tile), lambda j: (0, j)),
            ],
            out_specs=pl.BlockSpec((P, tile), lambda j: (0, j)),
            compiler_params=pltpu.CompilerParams(
                dimension_semantics=("parallel",),
                vmem_limit_bytes=32 * 1024 * 1024),
        )(mu2, ls2, eps)

    # Small / non-tile-aligned slab: a single grid step over the full extent.
    # block_shape == full array dims, so no (8,128) padding and no slicing.
    return pl.pallas_call(
        _reparam_kernel,
        out_shape=jax.ShapeDtypeStruct((P, N), jnp.float32),
        grid=(1,),
        in_specs=[
            pl.BlockSpec((1, N), lambda i: (0, 0)),
            pl.BlockSpec((1, N), lambda i: (0, 0)),
            pl.BlockSpec((P, N), lambda i: (0, 0)),
        ],
        out_specs=pl.BlockSpec((P, N), lambda i: (0, 0)),
    )(mu2, ls2, eps)


def build_htfa_guide_params(hyper_centers, hyper_weights, hyper_flw,
                            num_blocks, num_times, num_factors):
    """Mirror HTFAGuideHyperParams.__init__ (mu / log_sigma per site)."""
    K, B, T = num_factors, num_blocks, num_times
    params = {
        # template-level
        'template_factor_centers': (
            hyper_centers.astype(jnp.float32),          # mu (K, 3)
            jnp.zeros((K, 3), jnp.float32)),            # log_sigma
        'template_factor_log_widths': (
            jnp.full((K,), hyper_flw, jnp.float32),     # mu (K,)
            jnp.zeros((K,), jnp.float32)),
        # block-level
        'block_factor_centers': (
            jnp.tile(hyper_centers[None].astype(jnp.float32), (B, 1, 1)),
            jnp.zeros((B, K, 3), jnp.float32)),
        'block_factor_log_widths': (
            jnp.ones((B, K), jnp.float32) * hyper_flw,
            jnp.zeros((B, K), jnp.float32)),
        'block_weights': (
            jnp.broadcast_to(hyper_weights.mean(0)[None, None, :],
                             (B, T, K)).astype(jnp.float32),
            jnp.zeros((B, T, K), jnp.float32)),
    }
    assert tuple(params.keys()) == _SITE_ORDER
    return params


@jax.jit
def htfa_guide_forward(params, eps):
    """HTFAGuide.forward.

    params: dict name -> (mu, log_sigma)   (names == _SITE_ORDER)
    eps:    (P, N_total) standard-normal noise (the `trace.normal` draws),
            flat layout defined by _SITE_ORDER concatenation.

    Returns (subject, template):
      subject  = {'weights': (P,B,T,K), 'factor_centers': (P,B,K,3),
                  'factor_log_widths': (P,B,K)}   (stacked over blocks)
      template = {'factor_centers': (P,K,3), 'factor_log_widths': (P,K)}
    """
    mu_flat = jnp.concatenate([params[n][0].reshape(-1) for n in _SITE_ORDER])
    ls_flat = jnp.concatenate([params[n][1].reshape(-1) for n in _SITE_ORDER])

    samples_flat = reparam_sample(mu_flat, ls_flat, eps)

    P = eps.shape[0]
    samples = {}
    off = 0
    for n in _SITE_ORDER:
        shp = params[n][0].shape
        sz = int(np.prod(shp))
        samples[n] = samples_flat[:, off:off + sz].reshape((P,) + tuple(shp))
        off += sz

    subject = {
        'weights': samples['block_weights'],                    # (P, B, T, K)
        'factor_centers': samples['block_factor_centers'],      # (P, B, K, 3)
        'factor_log_widths': samples['block_factor_log_widths'],# (P, B, K)
    }
    template = {
        'factor_centers': samples['template_factor_centers'],
        'factor_log_widths': samples['template_factor_log_widths'],
    }
    return subject, template


def per_block_lists(subject, times=None, blocks=None):
    """Lazy PyTorch-style (weights, factor_centers, factor_log_widths) lists.

    Mirrors HTFAGuideSubjectPrior.forward's return structure; slicing is done
    only here, at the consumer, not inside the hot path.
    """
    num_blocks = subject['weights'].shape[1]
    if blocks is None:
        blocks = list(range(num_blocks))
    t0, t1 = (0, subject['weights'].shape[2]) if times is None else times
    weights = [subject['weights'][:, b, t0:t1] for b in blocks]
    factor_centers = [subject['factor_centers'][:, b] for b in blocks]
    factor_log_widths = [subject['factor_log_widths'][:, b] for b in blocks]
    return weights, factor_centers, factor_log_widths


if __name__ == "__main__":
    K = NUM_FACTORS      # num_factors
    B = 2                # num_blocks
    T = 8                # num_times
    P = NUM_PARTICLES    # num_particles
    INIT_T = 16          # times in the block used for initial_hypermeans

    key = jax.random.PRNGKey(0)
    k_centers, k_weights, k_eps = jax.random.split(key, 3)

    # deterministic synthetic hyper_means (stand-in for utils.initial_hypermeans)
    hyper_centers = jax.random.normal(k_centers, (K, 3), jnp.float32)
    hyper_weights = jax.random.normal(k_weights, (INIT_T, K), jnp.float32)
    hyper_flw = 2.0

    params = build_htfa_guide_params(hyper_centers, hyper_weights, hyper_flw,
                                     num_blocks=B, num_times=T, num_factors=K)

    n_total = sum(int(np.prod(v[0].shape)) for v in params.values())
    eps = jax.random.normal(k_eps, (P, n_total), jnp.float32)

    subject, template = jax.block_until_ready(htfa_guide_forward(params, eps))

    # shape checks against the PyTorch semantics (stacked over blocks)
    assert subject['weights'].shape == (P, B, T, K)
    assert subject['factor_centers'].shape == (P, B, K, 3)
    assert subject['factor_log_widths'].shape == (P, B, K)
    assert template['factor_centers'].shape == (P, K, 3)
    assert template['factor_log_widths'].shape == (P, K)

    # PyTorch-style per-block list view (lazy slicing at the consumer)
    w_list, fc_list, flw_list = per_block_lists(subject)
    assert len(w_list) == B and len(fc_list) == B and len(flw_list) == B
    assert w_list[0].shape == (P, T, K)
    assert fc_list[0].shape == (P, K, 3)
    assert flw_list[0].shape == (P, K)

    # reference check of the reparameterized-sampling hot path
    mu_flat = jnp.concatenate([params[n][0].reshape(-1) for n in _SITE_ORDER])
    ls_flat = jnp.concatenate([params[n][1].reshape(-1) for n in _SITE_ORDER])
    ref = mu_flat[None, :] + jnp.exp(ls_flat)[None, :] * eps
    got = reparam_sample(mu_flat, ls_flat, eps)
    np.testing.assert_allclose(np.asarray(got), np.asarray(ref),
                               rtol=1e-6, atol=1e-6)

    # stacked outputs must agree with the reference samples, site by site
    ref_flat = np.asarray(ref)
    off = 0
    for n in _SITE_ORDER:
        shp = params[n][0].shape
        sz = int(np.prod(shp))
        ref_site = ref_flat[:, off:off + sz].reshape((P,) + tuple(shp))
        off += sz
        if n == 'block_weights':
            np.testing.assert_allclose(np.asarray(subject['weights']),
                                       ref_site, rtol=1e-6, atol=1e-6)

    print("KERNEL_OK")
</pallas_src>

<mosaic_0001>
module attributes {stable_mosaic.version = 11 : i64} {
  func.func @_reparam_kernel(%arg0: i32, %arg1: memref<1x224xf32, #tpu.memory_space<vmem>>, %arg2: memref<1x224xf32, #tpu.memory_space<vmem>>, %arg3: memref<4x224xf32, #tpu.memory_space<vmem>>, %arg4: memref<4x224xf32, #tpu.memory_space<vmem>>) attributes {dimension_semantics = [#tpu.dimension_semantics<arbitrary>], iteration_bounds = array<i64: 1>, scalar_prefetch = 0 : i64, scratch_operands = 0 : i64, tpu.core_type = #tpu.core_type<tc>, window_params = [{pipeline_mode = #tpu.pipeline_mode<synchronous>, transform_indices = @transform_0, window_bounds = array<i64: 1, 224>}, {pipeline_mode = #tpu.pipeline_mode<synchronous>, transform_indices = @transform_1, window_bounds = array<i64: 1, 224>}, {pipeline_mode = #tpu.pipeline_mode<synchronous>, transform_indices = @transform_2, window_bounds = array<i64: 4, 224>}, {pipeline_mode = #tpu.pipeline_mode<synchronous>, transform_indices = @transform_3, window_bounds = array<i64: 4, 224>}]} {
    %c0 = arith.constant 0 : index
    %c0_0 = arith.constant 0 : index
    %0 = vector.load %arg1[%c0, %c0_0] : memref<1x224xf32, #tpu.memory_space<vmem>>, vector<1x224xf32>
    %c0_1 = arith.constant 0 : index
    %c0_2 = arith.constant 0 : index
    %1 = vector.load %arg2[%c0_1, %c0_2] : memref<1x224xf32, #tpu.memory_space<vmem>>, vector<1x224xf32>
    %2 = math.exp %1 : vector<1x224xf32>
    %c0_3 = arith.constant 0 : index
    %c0_4 = arith.constant 0 : index
    %3 = vector.load %arg3[%c0_3, %c0_4] : memref<4x224xf32, #tpu.memory_space<vmem>>, vector<4x224xf32>
    %4 = vector.broadcast %2 : vector<1x224xf32> to vector<4x224xf32>
    %5 = arith.mulf %4, %3 : vector<4x224xf32>
    %6 = vector.broadcast %0 : vector<1x224xf32> to vector<4x224xf32>
    %7 = arith.addf %6, %5 : vector<4x224xf32>
    %c0_5 = arith.constant 0 : index
    %c0_6 = arith.constant 0 : index
    %8 = vector.load %arg4[%c0_5, %c0_6] : memref<4x224xf32, #tpu.memory_space<vmem>>, vector<4x224xf32>
    tpu.vector_store %arg4[%c0_5, %c0_6], %7 {strides = array<i32>} : memref<4x224xf32, #tpu.memory_space<vmem>>, vector<4x224xf32>,
    return
  }
  func.func @transform_0(%arg0: i32) -> (i32, i32) {
    %c0_i32 = arith.constant 0 : i32
    %c0_i32_0 = arith.constant 0 : i32
    %c0_i32_1 = arith.constant 0 : i32
    return %c0_i32, %c0_i32_0 : i32, i32
  }
  func.func @transform_1(%arg0: i32) -> (i32, i32) {
    %c0_i32 = arith.constant 0 : i32
    %c0_i32_0 = arith.constant 0 : i32
    %c0_i32_1 = arith.constant 0 : i32
    return %c0_i32, %c0_i32_0 : i32, i32
  }
  func.func @transform_2(%arg0: i32) -> (i32, i32) {
    %c0_i32 = arith.constant 0 : i32
    %c0_i32_0 = arith.constant 0 : i32
    %c0_i32_1 = arith.constant 0 : i32
    return %c0_i32, %c0_i32_0 : i32, i32
  }
  func.func @transform_3(%arg0: i32) -> (i32, i32) {
    %c0_i32 = arith.constant 0 : i32
    %c0_i32_0 = arith.constant 0 : i32
    %c0_i32_1 = arith.constant 0 : i32
    return %c0_i32, %c0_i32_0 : i32, i32
  }
}

</mosaic_0001>

<bundles_post_ra>
// kernel: htfa_guide_forward.1
= control target key start
LH: loop header
LB: loop body
LE: loop exit
PB: predicated region body
PF: predicated region fallthrough
CT: control target
= control target key end

     0   :  { %v20_v2 = vlaneseq  ;;  %vm52_vm0 = vcmask 1043456   ;;  %vm53_vm1 = vcmask 785412   ;;  %s95_s1 = inlined_call_operand.vmem [shape: f32[1,224], index: 1, kind: input, shape index: {}]   ;;  %s96_s2 = inlined_call_operand.vmem [shape: f32[4,224], index: 2, kind: input, shape index: {}]   ;;  %s97_s0 = inlined_call_operand.vmem [shape: f32[1,224], index: 0, kind: input, shape index: {}]   ;;  %s98_s3 = inlined_call_operand.vmem [shape: f32[4,224], index: 3, kind: output, shape index: {}]  }
   0x1   :  { %v15_v0 = vld [vmem:[%s95_s1] sm:$0x3]  ;;  %vm54_vm2 = vmor %vm53_vm1, %vm52_vm0 }
   0x2   :  { %v16_v1 = vmul.f32 1.442695, %v15_v0  ;;  %v21_v3 = vshrl.u32 %v20_v2, 7  ;;  %v18_v4 = vld [vmem:[%s96_s2] sm:$0xff] }
   0x3   :  { %v14_v7 = vld [vmem:[%s97_s0] sm:$0x3]  ;;  %v31_v8 = vcombine.high %v18_v4, %v18_v4 }
   0x4   :  { %61 = vpow2.f32 %v16_v1  ;;  %v22_v5 = vsub.s32 0, %v21_v3  ;;  %v26_v6 = vsub.s32 1, %v21_v3 }
   0x6   :  { %v39_v12 = vrot.slane %v14_v7, %v22_v5  ;;  %v43_v13 = vrot.slane %v14_v7, %v26_v6 }
   0xe   :  { %v62_v9 = vpop.eup %61 }
   0xf   :  { %v23_v10 = vrot.slane %v62_v9, %v22_v5  ;;  %v27_v11 = vrot.slane %v62_v9, %v26_v6 }
  0x11   :  { %v33_v14 = vmul.f32 %v23_v10, %v18_v4  ;;  %v34_v15 = vmul.f32 %v31_v8, %v27_v11 }
  0x13   :  { %v46_v16 = vadd.f32 %v39_v12, %v33_v14  ;;  %v47_v17 = vadd.f32 %v43_v13, %v34_v15 }
  0x15   :  { %v50_v18 = vcombine.low %v46_v16, %v47_v17 }
  0x17   :  { %55 = vst.msk [vmem:[%s98_s3] sm:$0xff] %vm54_vm2, %v50_v18 }

</bundles_post_ra>
